<compile_context>
chip_gen: v7x
topology: tpu7x:2x2x1
jax: 0.10.0
libtpu: 0.0.40
codegen_flags: <defaults>
</compile_context>

<pallas_src>
import numpy as np
import jax
import jax.numpy as jnp
from jax import lax
from jax.experimental import pallas as pl
from jax.experimental.pallas import tpu as pltpu


def _round_up(x, m):
    return ((x + m - 1) // m) * m


# --------------------------------- kernel ------------------------------------
def bidaf_attention_kernel(c_ref, q_ref, qdot_ref, cbias_ref, qbias_ref,
                           cw_ref, cqw_ref, w_ref, blin_ref, out_ref):
    f32, bf16 = jnp.float32, jnp.bfloat16
    c = c_ref[...]                                    # (TB, Lc, Hp) f32
    q = q_ref[...]                                    # (TB, Lqp, Hp) f32
    c_bf = c.astype(bf16)

    # --- similarity matrix: s = <c, c_w> + ((q @ q_w)^T + bias) + c @ (q * cq_w)^T -----------
    s0 = jnp.sum(c * cw_ref[...], axis=-1, keepdims=True)                    # (TB, Lc, 1), VPU
    qcq = (q * cqw_ref[...]).astype(bf16)                                    # scale q, not c
    s = s0 + qdot_ref[...] + jnp.einsum("bch,bqh->bcq", c_bf, qcq,
                                        preferred_element_type=f32)          # (TB, Lc, Lqp)

    # --- softmax over the CONTEXT axis (dim=1), consumed immediately into qc = p2^T @ c ------
    sc = s + cbias_ref[...]                                                  # additive mask
    e2 = jnp.exp(sc - jnp.max(sc, axis=1, keepdims=True))
    p2 = (e2 * pl.reciprocal(jnp.sum(e2, axis=1, keepdims=True), approx=True)).astype(bf16)
    qc = jnp.einsum("bcq,bch->bqh", p2, c_bf, preferred_element_type=f32)    # (TB, Lqp, Hp)

    # --- softmax over the QUERY axis (dim=2) --------------------------------------------------
    sq = s + qbias_ref[...]
    e1 = jnp.exp(sq - jnp.max(sq, axis=2, keepdims=True))
    p1 = (e1 * pl.reciprocal(jnp.sum(e1, axis=2, keepdims=True), approx=True)).astype(bf16)

    a = jnp.einsum("bcq,bqh->bch", p1, q.astype(bf16), preferred_element_type=f32)   # c2q
    b = jnp.einsum("bcq,bqh->bch", p1, qc.astype(bf16), preferred_element_type=f32)  # q2c

    # relu(Linear(cat([c, a, c*a, c*b]))) as four accumulated matmuls -- no concat buffer.
    pre = jnp.einsum("bch,hk->bck", c_bf, w_ref[0], preferred_element_type=f32)
    pre += jnp.einsum("bch,hk->bck", a.astype(bf16), w_ref[1], preferred_element_type=f32)
    pre += jnp.einsum("bch,hk->bck", (c * a).astype(bf16), w_ref[2], preferred_element_type=f32)
    pre += jnp.einsum("bch,hk->bck", (c * b).astype(bf16), w_ref[3], preferred_element_type=f32)
    pre += blin_ref[...]
    out_ref[...] = jnp.maximum(pre, 0.0).astype(out_ref.dtype)


# --------------------------------- wrapper -----------------------------------
def bidaf_attention(params, c, q, c_mask, q_mask, batch_tile=None):
    B, Lc, H = c.shape
    Lq = q.shape[1]
    f32, bf16 = jnp.float32, jnp.bfloat16

    # Lane-dense padding: hidden and query-length axes to multiples of 128 (zeros; sliced off).
    Hp = _round_up(H, 128)
    Lqp = _round_up(Lq, 128)

    c_p = jnp.pad(c.astype(f32), ((0, 0), (0, 0), (0, Hp - H)))
    q_p = jnp.pad(q.astype(f32), ((0, 0), (0, Lqp - Lq), (0, Hp - H)))
    qmask_p = jnp.pad(q_mask.astype(f32), ((0, 0), (0, Lqp - Lq)))           # pad => masked out

    cw_p = jnp.pad(params["c_weight"].reshape(1, H), ((0, 0), (0, Hp - H)))
    cqw_p = jnp.pad(params["cq_weight"].reshape(1, H), ((0, 0), (0, Hp - H)))

    # (q @ q_weight)^T with the scalar bias folded in, pre-oriented as (B, 1, Lqp).
    q_dot = jnp.sum(q * params["q_weight"].reshape(1, 1, H), axis=-1) + params["bias"]
    q_dot = jnp.pad(q_dot, ((0, 0), (0, Lqp - Lq)))[:, None, :]

    # Additive masks: s + bias replaces the compare+select pair on the full (Lc, Lq) tensors.
    neg = jnp.float32(-1e30)
    qbias = jnp.where(qmask_p > 0, 0.0, neg)[:, None, :]                     # (B, 1, Lqp)
    cbias = jnp.where(c_mask.astype(f32) > 0, 0.0, neg)[:, :, None]          # (B, Lc, 1)

    # Output Linear weight (4H, H) -> four stacked (Hp, Hp) bf16 blocks (avoids concat in-kernel).
    w_p = jnp.pad(params["w"].reshape(4, H, H),
                  ((0, 0), (0, Hp - H), (0, Hp - H))).astype(bf16)
    blin_p = jnp.pad(params["b_lin"].reshape(1, H), ((0, 0), (0, Hp - H)))

    # Batch tile: enough grid steps for DMA/compute overlap and v7x dual-TC sharding.
    if batch_tile is None:
        tb = max(1, B // 8)
        while B % tb:
            tb -= 1
    else:
        tb = batch_tile
    assert B % tb == 0, "batch_tile must divide the batch size"

    # Explicit VMEM budget: double-buffered blocks + live intermediates, with headroom.
    # Cap at 48 MiB so the limit stays valid on v7x (64 MiB physical per TC).
    bpf = 4
    blk = bpf * tb * (2 * Lc * Hp + Lqp * Hp + 2 * Lqp + Lc) \
        + 2 * 4 * Hp * Hp + 3 * bpf * Hp
    inter = bpf * tb * (6 * Lc * Lqp + 4 * Lc * Hp + Lqp * Hp)
    vmem_limit = int(min(48 * 2**20, max(32 * 2**20, 2 * (2 * blk + inter))))

    batched = lambda shp: pl.BlockSpec(shp, lambda i: (i,) + (0,) * (len(shp) - 1))
    shared = lambda shp: pl.BlockSpec(shp, lambda i: (0,) * len(shp))

    out = pl.pallas_call(
        bidaf_attention_kernel,
        out_shape=jax.ShapeDtypeStruct((B, Lc, Hp), f32),
        grid=(B // tb,),
        in_specs=[batched((tb, Lc, Hp)),     # c (padded)
                  batched((tb, Lqp, Hp)),    # q (padded)
                  batched((tb, 1, Lqp)),     # q @ q_weight + bias
                  batched((tb, Lc, 1)),      # additive context mask
                  batched((tb, 1, Lqp)),     # additive query mask
                  shared((1, Hp)),           # c_weight row
                  shared((1, Hp)),           # cq_weight row
                  shared((4, Hp, Hp)),       # output Linear weight, stacked, bf16
                  shared((1, Hp))],          # output Linear bias
        out_specs=batched((tb, Lc, Hp)),
        compiler_params=pltpu.CompilerParams(
            dimension_semantics=("parallel",),
            vmem_limit_bytes=vmem_limit),
    )(c_p, q_p, q_dot, cbias, qbias, cw_p, cqw_p, w_p, blin_p)
    return out[:, :, :H]


# ------------------------------ pure-JAX reference ---------------------------
def reference(params, c, q, c_mask, q_mask):
    hi = lax.Precision.HIGHEST
    H = c.shape[-1]
    s0 = jnp.sum(c * params["c_weight"].reshape(1, 1, H), axis=-1, keepdims=True)
    s1 = jnp.sum(q * params["q_weight"].reshape(1, 1, H), axis=-1)[:, None, :]
    s2 = jnp.einsum("bch,bqh->bcq", c * params["cq_weight"].reshape(1, 1, H), q, precision=hi)
    s = s0 + s1 + s2 + params["bias"]
    qm = q_mask[:, None, :]
    cm = c_mask[:, :, None]
    p1 = jax.nn.softmax(qm * s + (1.0 - qm) * (-1e30), axis=2)
    p2 = jax.nn.softmax(cm * s + (1.0 - cm) * (-1e30), axis=1)
    a = jnp.einsum("bcq,bqh->bch", p1, q, precision=hi)
    b = jnp.einsum("bcd,bdh->bch",
                   jnp.einsum("bcq,bdq->bcd", p1, p2, precision=hi), c, precision=hi)
    x = jnp.concatenate([c, a, c * a, c * b], axis=-1)
    pre = jnp.einsum("bcf,fh->bch", x, params["w"], precision=hi) + params["b_lin"]
    return jnp.maximum(pre, 0.0)


# --------------------------------- params ------------------------------------
def init_params(key, H):
    ks = jax.random.split(key, 6)

    def u(k, shape, bound):
        return jax.random.uniform(k, shape, jnp.float32, -bound, bound)

    kx1 = float(np.sqrt(6.0 / (H + 1)))     # xavier_uniform_ bound for (H, 1)
    kxq = float(np.sqrt(6.0 / (2 * H)))     # xavier_uniform_ bound for (1, 1, H)
    kl = 1.0 / float(np.sqrt(4 * H))        # nn.Linear(4H, H) default bound
    return dict(
        c_weight=u(ks[0], (H, 1), kx1),
        q_weight=u(ks[1], (H, 1), kx1),
        cq_weight=u(ks[2], (1, 1, H), kxq),
        bias=u(ks[3], (1,), 0.1),            # torch inits this to zero; random to exercise it
        w=u(ks[4], (4 * H, H), kl),          # transposed Linear weight (x @ w)
        b_lin=u(ks[5], (1, H), kl),
    )


if __name__ == "__main__":
    B, Lc, Lq, H = 2, 16, 8, 32              # batch, context len, query len, hidden_size

    key = jax.random.PRNGKey(0)
    kp, kc, kq = jax.random.split(key, 3)
    params = init_params(kp, H)

    c = jax.random.normal(kc, (B, Lc, H), jnp.float32)
    q = jax.random.normal(kq, (B, Lq, H), jnp.float32)
    c_len = jnp.array([Lc, 11], dtype=jnp.int32)
    q_len = jnp.array([Lq, 5], dtype=jnp.int32)
    c_mask = (jnp.arange(Lc)[None, :] < c_len[:, None]).astype(jnp.float32)
    q_mask = (jnp.arange(Lq)[None, :] < q_len[:, None]).astype(jnp.float32)

    out = bidaf_attention(params, c, q, c_mask, q_mask)
    out = jax.block_until_ready(out)

    ref = reference(params, c, q, c_mask, q_mask)
    # bf16 MXU operands (f32 accumulation) + approx reciprocal => slightly looser tolerance
    # than the pure-f32 version; still tight enough to catch masking / softmax-axis bugs.
    np.testing.assert_allclose(np.asarray(out), np.asarray(ref), rtol=2e-2, atol=2e-2)
    print("KERNEL_OK")
</pallas_src>

<mosaic_0001>
module attributes {stable_mosaic.version = 11 : i64} {
  func.func @bidaf_attention_kernel(%arg0: i32, %arg1: memref<1x16x128xf32, #tpu.memory_space<vmem>>, %arg2: memref<1x128x128xf32, #tpu.memory_space<vmem>>, %arg3: memref<1x1x128xf32, #tpu.memory_space<vmem>>, %arg4: memref<1x16x1xf32, #tpu.memory_space<vmem>>, %arg5: memref<1x1x128xf32, #tpu.memory_space<vmem>>, %arg6: memref<1x128xf32, #tpu.memory_space<vmem>>, %arg7: memref<1x128xf32, #tpu.memory_space<vmem>>, %arg8: memref<4x128x128xbf16, #tpu.memory_space<vmem>>, %arg9: memref<1x128xf32, #tpu.memory_space<vmem>>, %arg10: memref<1x16x128xf32, #tpu.memory_space<vmem>>) attributes {dimension_semantics = [#tpu.dimension_semantics<parallel>], iteration_bounds = array<i64: 2>, scalar_prefetch = 0 : i64, scratch_operands = 0 : i64, tpu.core_type = #tpu.core_type<tc>, window_params = [{transform_indices = @transform_0, window_bounds = array<i64: 1, 16, 128>}, {transform_indices = @transform_1, window_bounds = array<i64: 1, 128, 128>}, {transform_indices = @transform_2, window_bounds = array<i64: 1, 1, 128>}, {transform_indices = @transform_3, window_bounds = array<i64: 1, 16, 1>}, {transform_indices = @transform_4, window_bounds = array<i64: 1, 1, 128>}, {pipeline_mode = #tpu.pipeline_mode<synchronous>, transform_indices = @transform_5, window_bounds = array<i64: 1, 128>}, {pipeline_mode = #tpu.pipeline_mode<synchronous>, transform_indices = @transform_6, window_bounds = array<i64: 1, 128>}, {pipeline_mode = #tpu.pipeline_mode<synchronous>, transform_indices = @transform_7, window_bounds = array<i64: 4, 128, 128>}, {pipeline_mode = #tpu.pipeline_mode<synchronous>, transform_indices = @transform_8, window_bounds = array<i64: 1, 128>}, {transform_indices = @transform_9, window_bounds = array<i64: 1, 16, 128>}]} {
    %c0 = arith.constant 0 : index
    %c0_0 = arith.constant 0 : index
    %c0_1 = arith.constant 0 : index
    %0 = vector.load %arg1[%c0, %c0_0, %c0_1] : memref<1x16x128xf32, #tpu.memory_space<vmem>>, vector<1x16x128xf32>
    %c0_2 = arith.constant 0 : index
    %c0_3 = arith.constant 0 : index
    %c0_4 = arith.constant 0 : index
    %1 = vector.load %arg2[%c0_2, %c0_3, %c0_4] : memref<1x128x128xf32, #tpu.memory_space<vmem>>, vector<1x128x128xf32>
    %2 = arith.truncf %0 : vector<1x16x128xf32> to vector<1x16x128xbf16>
    %c0_5 = arith.constant 0 : index
    %c0_6 = arith.constant 0 : index
    %3 = vector.load %arg6[%c0_5, %c0_6] : memref<1x128xf32, #tpu.memory_space<vmem>>, vector<1x128xf32>
    %4 = vector.shape_cast %3 : vector<1x128xf32> to vector<1x1x128xf32>
    %5 = vector.broadcast %4 : vector<1x1x128xf32> to vector<1x16x128xf32>
    %6 = arith.mulf %0, %5 : vector<1x16x128xf32>
    %cst = arith.constant dense<0.000000e+00> : vector<1x16xf32>
    %7 = vector.multi_reduction <add>, %6, %cst [2] : vector<1x16x128xf32> to vector<1x16xf32>
    %8 = vector.shape_cast %7 : vector<1x16xf32> to vector<1x16x1xf32>
    %c0_7 = arith.constant 0 : index
    %c0_8 = arith.constant 0 : index
    %9 = vector.load %arg7[%c0_7, %c0_8] : memref<1x128xf32, #tpu.memory_space<vmem>>, vector<1x128xf32>
    %10 = vector.shape_cast %9 : vector<1x128xf32> to vector<1x1x128xf32>
    %11 = vector.broadcast %10 : vector<1x1x128xf32> to vector<1x128x128xf32>
    %12 = arith.mulf %1, %11 : vector<1x128x128xf32>
    %13 = arith.truncf %12 : vector<1x128x128xf32> to vector<1x128x128xbf16>
    %c0_9 = arith.constant 0 : index
    %c0_10 = arith.constant 0 : index
    %c0_11 = arith.constant 0 : index
    %14 = vector.load %arg3[%c0_9, %c0_10, %c0_11] : memref<1x1x128xf32, #tpu.memory_space<vmem>>, vector<1x1x128xf32>
    %15 = vector.broadcast %8 : vector<1x16x1xf32> to vector<1x16x128xf32>
    %16 = vector.broadcast %14 : vector<1x1x128xf32> to vector<1x16x128xf32>
    %17 = arith.addf %15, %16 : vector<1x16x128xf32>
    "tpu.trace_start"() <{level = 10 : i32, message = "bch,bqh->bcq"}> : () -> ()
    %cst_12 = arith.constant dense<0.000000e+00> : vector<1x16x128xf32>
    %18 = tpu.matmul %2, %13, %cst_12 {dimension_numbers = #tpu.dot_dimension_numbers<[2], [2], [1], [1], [0, 0, 0, 1, 1, 1], [0], [0]>} : vector<1x16x128xbf16>, vector<1x128x128xbf16>, vector<1x16x128xf32> -> vector<1x16x128xf32>
    "tpu.trace_stop"() : () -> ()
    %19 = arith.addf %17, %18 : vector<1x16x128xf32>
    %c0_13 = arith.constant 0 : index
    %c0_14 = arith.constant 0 : index
    %c0_15 = arith.constant 0 : index
    %20 = vector.load %arg4[%c0_13, %c0_14, %c0_15] : memref<1x16x1xf32, #tpu.memory_space<vmem>>, vector<1x16x1xf32>
    %21 = vector.broadcast %20 : vector<1x16x1xf32> to vector<1x16x128xf32>
    %22 = arith.addf %19, %21 : vector<1x16x128xf32>
    %cst_16 = arith.constant dense<0xFF800000> : vector<1x128xf32>
    %23 = vector.multi_reduction <maximumf>, %22, %cst_16 [1] : vector<1x16x128xf32> to vector<1x128xf32>
    %24 = vector.shape_cast %23 : vector<1x128xf32> to vector<1x1x128xf32>
    %25 = vector.broadcast %24 : vector<1x1x128xf32> to vector<1x16x128xf32>
    %26 = arith.subf %22, %25 : vector<1x16x128xf32>
    %27 = math.exp %26 : vector<1x16x128xf32>
    %cst_17 = arith.constant dense<0.000000e+00> : vector<1x128xf32>
    %28 = vector.multi_reduction <add>, %27, %cst_17 [1] : vector<1x16x128xf32> to vector<1x128xf32>
    %29 = vector.shape_cast %28 : vector<1x128xf32> to vector<1x1x128xf32>
    %30 = tpu.reciprocal %29 {approx = true} : vector<1x1x128xf32> -> vector<1x1x128xf32>
    %31 = vector.broadcast %30 : vector<1x1x128xf32> to vector<1x16x128xf32>
    %32 = arith.mulf %27, %31 : vector<1x16x128xf32>
    %33 = arith.truncf %32 : vector<1x16x128xf32> to vector<1x16x128xbf16>
    "tpu.trace_start"() <{level = 10 : i32, message = "bcq,bch->bqh"}> : () -> ()
    %cst_18 = arith.constant dense<0.000000e+00> : vector<1x128x128xf32>
    %34 = tpu.matmul %33, %2, %cst_18 {dimension_numbers = #tpu.dot_dimension_numbers<[1], [1], [2], [2], [0, 0, 0, 2, 1, 2], [0], [0]>} : vector<1x16x128xbf16>, vector<1x16x128xbf16>, vector<1x128x128xf32> -> vector<1x128x128xf32>
    "tpu.trace_stop"() : () -> ()
    %c0_19 = arith.constant 0 : index
    %c0_20 = arith.constant 0 : index
    %c0_21 = arith.constant 0 : index
    %35 = vector.load %arg5[%c0_19, %c0_20, %c0_21] : memref<1x1x128xf32, #tpu.memory_space<vmem>>, vector<1x1x128xf32>
    %36 = vector.broadcast %35 : vector<1x1x128xf32> to vector<1x16x128xf32>
    %37 = arith.addf %19, %36 : vector<1x16x128xf32>
    %cst_22 = arith.constant dense<0xFF800000> : vector<1x16xf32>
    %38 = vector.multi_reduction <maximumf>, %37, %cst_22 [2] : vector<1x16x128xf32> to vector<1x16xf32>
    %39 = vector.shape_cast %38 : vector<1x16xf32> to vector<1x16x1xf32>
    %40 = vector.broadcast %39 : vector<1x16x1xf32> to vector<1x16x128xf32>
    %41 = arith.subf %37, %40 : vector<1x16x128xf32>
    %42 = math.exp %41 : vector<1x16x128xf32>
    %cst_23 = arith.constant dense<0.000000e+00> : vector<1x16xf32>
    %43 = vector.multi_reduction <add>, %42, %cst_23 [2] : vector<1x16x128xf32> to vector<1x16xf32>
    %44 = vector.shape_cast %43 : vector<1x16xf32> to vector<1x16x1xf32>
    %45 = tpu.reciprocal %44 {approx = true} : vector<1x16x1xf32> -> vector<1x16x1xf32>
    %46 = vector.broadcast %45 : vector<1x16x1xf32> to vector<1x16x128xf32>
    %47 = arith.mulf %42, %46 : vector<1x16x128xf32>
    %48 = arith.truncf %47 : vector<1x16x128xf32> to vector<1x16x128xbf16>
    %49 = arith.truncf %1 : vector<1x128x128xf32> to vector<1x128x128xbf16>
    "tpu.trace_start"() <{level = 10 : i32, message = "bcq,bqh->bch"}> : () -> ()
    %cst_24 = arith.constant dense<0.000000e+00> : vector<1x16x128xf32>
    %50 = tpu.matmul %48, %49, %cst_24 {dimension_numbers = #tpu.dot_dimension_numbers<[2], [1], [1], [2], [0, 0, 0, 1, 1, 2], [0], [0]>} : vector<1x16x128xbf16>, vector<1x128x128xbf16>, vector<1x16x128xf32> -> vector<1x16x128xf32>
    "tpu.trace_stop"() : () -> ()
    %51 = arith.truncf %34 : vector<1x128x128xf32> to vector<1x128x128xbf16>
    "tpu.trace_start"() <{level = 10 : i32, message = "bcq,bqh->bch"}> : () -> ()
    %cst_25 = arith.constant dense<0.000000e+00> : vector<1x16x128xf32>
    %52 = tpu.matmul %48, %51, %cst_25 {dimension_numbers = #tpu.dot_dimension_numbers<[2], [1], [1], [2], [0, 0, 0, 1, 1, 2], [0], [0]>} : vector<1x16x128xbf16>, vector<1x128x128xbf16>, vector<1x16x128xf32> -> vector<1x16x128xf32>
    "tpu.trace_stop"() : () -> ()
    %c0_26 = arith.constant 0 : index
    %c0_27 = arith.constant 0 : index
    %c0_28 = arith.constant 0 : index
    %53 = vector.load %arg8[%c0_26, %c0_27, %c0_28] : memref<4x128x128xbf16, #tpu.memory_space<vmem>>, vector<1x128x128xbf16>
    %54 = vector.shape_cast %53 : vector<1x128x128xbf16> to vector<128x128xbf16>
    "tpu.trace_start"() <{level = 10 : i32, message = "bch,hk->bck"}> : () -> ()
    %cst_29 = arith.constant dense<0.000000e+00> : vector<1x16x128xf32>
    %55 = tpu.matmul %2, %54, %cst_29 {dimension_numbers = #tpu.dot_dimension_numbers<[2], [0], [0, 1], [1], [0, 0, 0, 1, 1, 1], [], []>} : vector<1x16x128xbf16>, vector<128x128xbf16>, vector<1x16x128xf32> -> vector<1x16x128xf32>
    "tpu.trace_stop"() : () -> ()
    %56 = arith.truncf %50 : vector<1x16x128xf32> to vector<1x16x128xbf16>
    %c1 = arith.constant 1 : index
    %c0_30 = arith.constant 0 : index
    %c0_31 = arith.constant 0 : index
    %57 = vector.load %arg8[%c1, %c0_30, %c0_31] : memref<4x128x128xbf16, #tpu.memory_space<vmem>>, vector<1x128x128xbf16>
    %58 = vector.shape_cast %57 : vector<1x128x128xbf16> to vector<128x128xbf16>
    "tpu.trace_start"() <{level = 10 : i32, message = "bch,hk->bck"}> : () -> ()
    %cst_32 = arith.constant dense<0.000000e+00> : vector<1x16x128xf32>
    %59 = tpu.matmul %56, %58, %cst_32 {dimension_numbers = #tpu.dot_dimension_numbers<[2], [0], [0, 1], [1], [0, 0, 0, 1, 1, 1], [], []>} : vector<1x16x128xbf16>, vector<128x128xbf16>, vector<1x16x128xf32> -> vector<1x16x128xf32>
    "tpu.trace_stop"() : () -> ()
    %60 = arith.addf %55, %59 : vector<1x16x128xf32>
    %61 = arith.mulf %0, %50 : vector<1x16x128xf32>
    %62 = arith.truncf %61 : vector<1x16x128xf32> to vector<1x16x128xbf16>
    %c2 = arith.constant 2 : index
    %c0_33 = arith.constant 0 : index
    %c0_34 = arith.constant 0 : index
    %63 = vector.load %arg8[%c2, %c0_33, %c0_34] : memref<4x128x128xbf16, #tpu.memory_space<vmem>>, vector<1x128x128xbf16>
    %64 = vector.shape_cast %63 : vector<1x128x128xbf16> to vector<128x128xbf16>
    "tpu.trace_start"() <{level = 10 : i32, message = "bch,hk->bck"}> : () -> ()
    %cst_35 = arith.constant dense<0.000000e+00> : vector<1x16x128xf32>
    %65 = tpu.matmul %62, %64, %cst_35 {dimension_numbers = #tpu.dot_dimension_numbers<[2], [0], [0, 1], [1], [0, 0, 0, 1, 1, 1], [], []>} : vector<1x16x128xbf16>, vector<128x128xbf16>, vector<1x16x128xf32> -> vector<1x16x128xf32>
    "tpu.trace_stop"() : () -> ()
    %66 = arith.addf %60, %65 : vector<1x16x128xf32>
    %67 = arith.mulf %0, %52 : vector<1x16x128xf32>
    %68 = arith.truncf %67 : vector<1x16x128xf32> to vector<1x16x128xbf16>
    %c3 = arith.constant 3 : index
    %c0_36 = arith.constant 0 : index
    %c0_37 = arith.constant 0 : index
    %69 = vector.load %arg8[%c3, %c0_36, %c0_37] : memref<4x128x128xbf16, #tpu.memory_space<vmem>>, vector<1x128x128xbf16>
    %70 = vector.shape_cast %69 : vector<1x128x128xbf16> to vector<128x128xbf16>
    "tpu.trace_start"() <{level = 10 : i32, message = "bch,hk->bck"}> : () -> ()
    %cst_38 = arith.constant dense<0.000000e+00> : vector<1x16x128xf32>
    %71 = tpu.matmul %68, %70, %cst_38 {dimension_numbers = #tpu.dot_dimension_numbers<[2], [0], [0, 1], [1], [0, 0, 0, 1, 1, 1], [], []>} : vector<1x16x128xbf16>, vector<128x128xbf16>, vector<1x16x128xf32> -> vector<1x16x128xf32>
    "tpu.trace_stop"() : () -> ()
    %72 = arith.addf %66, %71 : vector<1x16x128xf32>
    %c0_39 = arith.constant 0 : index
    %c0_40 = arith.constant 0 : index
    %73 = vector.load %arg9[%c0_39, %c0_40] : memref<1x128xf32, #tpu.memory_space<vmem>>, vector<1x128xf32>
    %74 = vector.shape_cast %73 : vector<1x128xf32> to vector<1x1x128xf32>
    %75 = vector.broadcast %74 : vector<1x1x128xf32> to vector<1x16x128xf32>
    %76 = arith.addf %72, %75 : vector<1x16x128xf32>
    %cst_41 = arith.constant 0.000000e+00 : f32
    %77 = vector.broadcast %cst_41 : f32 to vector<1x16x128xf32>
    %78 = arith.maximumf %76, %77 : vector<1x16x128xf32>
    %c0_42 = arith.constant 0 : index
    %c0_43 = arith.constant 0 : index
    %c0_44 = arith.constant 0 : index
    %79 = vector.load %arg10[%c0_42, %c0_43, %c0_44] : memref<1x16x128xf32, #tpu.memory_space<vmem>>, vector<1x16x128xf32>
    tpu.vector_store %arg10[%c0_42, %c0_43, %c0_44], %78 {strides = array<i32>} : memref<1x16x128xf32, #tpu.memory_space<vmem>>, vector<1x16x128xf32>,
    return
  }
  func.func @transform_0(%arg0: i32) -> (i32, i32, i32) {
    %c0_i32 = arith.constant 0 : i32
    %c0_i32_0 = arith.constant 0 : i32
    %c0_i32_1 = arith.constant 0 : i32
    return %arg0, %c0_i32, %c0_i32_0 : i32, i32, i32
  }
  func.func @transform_1(%arg0: i32) -> (i32, i32, i32) {
    %c0_i32 = arith.constant 0 : i32
    %c0_i32_0 = arith.constant 0 : i32
    %c0_i32_1 = arith.constant 0 : i32
    return %arg0, %c0_i32, %c0_i32_0 : i32, i32, i32
  }
  func.func @transform_2(%arg0: i32) -> (i32, i32, i32) {
    %c0_i32 = arith.constant 0 : i32
    %c0_i32_0 = arith.constant 0 : i32
    %c0_i32_1 = arith.constant 0 : i32
    return %arg0, %c0_i32, %c0_i32_0 : i32, i32, i32
  }
  func.func @transform_3(%arg0: i32) -> (i32, i32, i32) {
    %c0_i32 = arith.constant 0 : i32
    %c0_i32_0 = arith.constant 0 : i32
    %c0_i32_1 = arith.constant 0 : i32
    return %arg0, %c0_i32, %c0_i32_0 : i32, i32, i32
  }
  func.func @transform_4(%arg0: i32) -> (i32, i32, i32) {
    %c0_i32 = arith.constant 0 : i32
    %c0_i32_0 = arith.constant 0 : i32
    %c0_i32_1 = arith.constant 0 : i32
    return %arg0, %c0_i32, %c0_i32_0 : i32, i32, i32
  }
  func.func @transform_5(%arg0: i32) -> (i32, i32) {
    %c0_i32 = arith.constant 0 : i32
    %c0_i32_0 = arith.constant 0 : i32
    %c0_i32_1 = arith.constant 0 : i32
    return %c0_i32, %c0_i32_0 : i32, i32
  }
  func.func @transform_6(%arg0: i32) -> (i32, i32) {
    %c0_i32 = arith.constant 0 : i32
    %c0_i32_0 = arith.constant 0 : i32
    %c0_i32_1 = arith.constant 0 : i32
    return %c0_i32, %c0_i32_0 : i32, i32
  }
  func.func @transform_7(%arg0: i32) -> (i32, i32, i32) {
    %c0_i32 = arith.constant 0 : i32
    %c0_i32_0 = arith.constant 0 : i32
    %c0_i32_1 = arith.constant 0 : i32
    %c0_i32_2 = arith.constant 0 : i32
    return %c0_i32, %c0_i32_0, %c0_i32_1 : i32, i32, i32
  }
  func.func @transform_8(%arg0: i32) -> (i32, i32) {
    %c0_i32 = arith.constant 0 : i32
    %c0_i32_0 = arith.constant 0 : i32
    %c0_i32_1 = arith.constant 0 : i32
    return %c0_i32, %c0_i32_0 : i32, i32
  }
  func.func @transform_9(%arg0: i32) -> (i32, i32, i32) {
    %c0_i32 = arith.constant 0 : i32
    %c0_i32_0 = arith.constant 0 : i32
    %c0_i32_1 = arith.constant 0 : i32
    return %arg0, %c0_i32, %c0_i32_0 : i32, i32, i32
  }
}

</mosaic_0001>

<bundles_post_ra>
// kernel: tpu_custom_call.1
= control target key start
LH: loop header
LB: loop body
LE: loop exit
PB: predicated region body
PF: predicated region fallthrough
CT: control target
= control target key end

     0   :  { %14 = vsyncpa [#allocation3], 0  ;;  %s2482_s0 = inlined_call_operand.vmem [shape: f32[2,16,128], index: 0, kind: input, shape index: {}]   ;;  %s2483_s1 = inlined_call_operand.hbm [shape: f32[2,128,128], index: 1, kind: input, shape index: {}]   ;;  %s2484_s2 = inlined_call_operand.vmem [shape: f32[2,1,128], index: 2, kind: input, shape index: {}]   ;;  %s2485_s3 = inlined_call_operand.vmem [shape: f32[2,16,1], index: 3, kind: input, shape index: {}]   ;;  %s2486_s4 = inlined_call_operand.vmem [shape: f32[2,1,128], index: 4, kind: input, shape index: {}]   ;;  %s2487_s5 = inlined_call_operand.vmem [shape: f32[1,128], index: 5, kind: input, shape index: {}]   ;;  %s2488_s6 = inlined_call_operand.vmem [shape: f32[1,128], index: 6, kind: input, shape index: {}]   ;;  %s2489_s7 = inlined_call_operand.hbm [shape: bf16[4,128,128], index: 7, kind: input, shape index: {}]   ;;  %s2490_s8 = inlined_call_operand.vmem [shape: f32[1,128], index: 8, kind: input, shape index: {}]   ;;  %s2491_s9 = inlined_call_operand.hbm [shape: f32[2,16,128], index: 9, kind: output, shape index: {}]  }
   0x1   :  { %16 = vsyncpa [#allocation3 + $0x1], 0 }
   0x2   :  { %17 = vsyncpa [#allocation6], 0 }
   0x3   :  { %18 = vsyncpa [#allocation4], 0 }
   0x4   :  { %20 = vsyncpa [#allocation4 + $0x1], 0  ;;  %s2043_s30 = smov 0   ;;  %s2045_s10 = smov 0  }
   0x5   :  { %s2047_s11 = smov 0   ;;  %s2049_s12 = smov 0  }
   0x6 LB: > { %s2064_s13 = sadd.s32 4294967295, %s1979_s12   ;;  %s1438_s14 = sadd.s32 4294967294, %s1979_s12   ;;  %s1979_s12 = sphi %s2049_s12, %s2514_s12   ;;  %s1975_s11 = sphi %s2047_s11, %s2517_s11   ;;  %s1971_s10 = sphi %s2045_s10, %s2516_s10   ;;  %s1967_s30 = sphi %s2043_s30, %s2515_s30  }
   0x7   : > { %p72_p0 = scmp.ne.s32.totalorder %s1971_s10, %s1967_s30  ;;  %p2492_p1 = scmp.eq.s32.totalorder %s2064_s13, 0 }
   0x8   : > { %p264_p3 = scmp.eq.s32.totalorder %s1438_s14, 1  ;;  %p1439_p5 = scmp.ge.s32.totalorder %s1979_s12, 1 }
   0x9   : > { %p2073_p4 = por %p2492_p1, %p72_p0  ;;  %p271_p7 = scmp.lt.s32.totalorder %s1979_s12, 3 }
   0xa   : > { %p2078_p6 = por %p264_p3, %p72_p0  ;;  %s1981_s18 = smov [#allocation5]  }
   0xb   : > { %s2498_s15 = scalar_select %p2073_p4, 1, 0 }
   0xc   : > { %s2499_s16 = scalar_select %p2078_p6, 1, 0 }
   0xd   : > { %p2083_p8 = pnand %p1439_p5, %p271_p7  ;;  %s289_s19 = sshll.u32 %s1981_s18, 4  ;;  %s2087_s19 = int_to_ptr.vmem [resolvable:$true] %s289_s19 }
   0xe   : > { %2500 = sst [smem:[#allocation11_spill]] %s2499_s16  ;;  %s2099_s21 = sadd.s32 1, %s1979_s12  }
   0xf   : > { %s2501_s17 = scalar_select %p2083_p8, 1, 0 }
  0x10   : > { %p1745_p9 = pneg %p2083_p8  ;;  %2503 = sst [smem:[#allocation12_spill]] %s2099_s21 }
  0x11   : > { %s59_s22 = sadd.s32 1, %s1975_s11  ;;  %s56_s23 = ssub.s32 %s1979_s12, %s2099_s21 }
  0x12   : > { %p2094_p11 = pnand %p1745_p9, %p2492_p1  ;;  %s1851_s26 = scalar_lea.hbm %s2489_s7, 4096 }
  0x13   : > { %p1852_p12 = scmp.ne.s32.totalorder %s2489_s7, %s1851_s26  ;;  %p1858_p5 = scmp.lt.u32.totalorder %s1851_s26, %s2489_s7 }
  0x14   : > { %p1853_p13 = pneg %p2094_p11 }
  0x16   : > { %p1854_p0 = pnand %p1853_p13, %p1852_p12 }
  0x18   : > { %p1855_p3 = pneg %p1854_p0 }
  0x1a   : > { %p1860_p7 = pnand %p1858_p5, %p1855_p3 }
  0x1c   : > { %1863 = shalt.err (!%p1860_p7)
}
  0x1d   : > { %s1864_s18 = scalar_lea.vmem %s2087_s19, 4096  ;;  %p1872_p2 = scmp.lt.s32.totalorder %s2087_s19, %s2087_s19 }
  0x1e   : > { %p1865_p9 = scmp.ne.s32.totalorder %s2087_s19, %s1864_s18  ;;  %p1873_p6 = scmp.lt.s32.totalorder %s1864_s18, %s1864_s18 }
  0x20   : > { %p1867_p10 = pnand %p1865_p9, %p1853_p13  ;;  %p1874_p4 = por %p1873_p6, %p1872_p2 }
  0x22   : > { %p1868_p1 = pneg %p1867_p10 }
  0x24   : > { %p1875_p8 = pnand %p1874_p4, %p1868_p1 }
  0x26   : > { %1878 = shalt.err (!%p1875_p8)
}
  0x27   : > { %s1982_s24 = smov 64   ;;  %s1983_s25 = smov 4  }
  0x28   : > { %1748 = dma.hbm_to_vmem [thread:$0]  (!%p2094_p11), %s2489_s7, 4096, %s2087_s19, [#allocation6], %s1982_s24, %s1982_s24, %s1983_s25  }
  0x29   : > { %p57_p2 = scmp.eq.s32.totalorder %s56_s23, 0  ;;  %p66_p1 = scmp.ne.s32.totalorder %s1975_s11, %s1971_s10 }
  0x2a   : > { %p67_p4 = scmp.eq.s32.totalorder %s1979_s12, 0  ;;  %p1758_p6 = scmp.lt.s32.totalorder %s1979_s12, 2 }
  0x2b   : > { %s2130_s28 = scalar_select %p57_p2, %s1975_s11, %s59_s22  }
  0x2c   : > { %p68_p8 = por %p67_p4, %p66_p1  ;;  %p2504_p10 = scmp.eq.s32.totalorder %s2064_s13, 1 }
  0x2d   : > { %s314_s14 = sand.u32 1, %s1975_s11   ;;  %s1503_s18 = sshll.u32 %s1979_s12, 11 }
  0x2e   : > { %p2134_p12 = por %p2504_p10, %p66_p1  ;;  %s1442_s21 = sshll.u32 %s314_s14, 7 }
  0x2f   : > { %s2143_s26 = scalar_lea.hbm %s2483_s1, %s1503_s18  ;;  %s318_s19 = scalar_lea.vmem [#allocation2], %s1442_s21 }
  0x30   : > { %s325_s22 = sshll.u32 %s318_s19, 4  ;;  %p2145_p11 = pnand %p1758_p6, %p68_p8  ;;  %s2149_s22 = int_to_ptr.vmem [resolvable:$true] %s325_s22 }
  0x31   : > { %s2151_s24 = scalar_lea.sflag [#allocation3], %s314_s14  ;;  %s1879_s25 = scalar_lea.hbm %s2143_s26, 2048 }
  0x32   : > { %p1880_p13 = scmp.ne.s32.totalorder %s2143_s26, %s1879_s25  ;;  %p1881_p0 = pneg %p2145_p11 }
  0x33   : > { %s1884_s27 = scalar_lea.hbm %s2483_s1, 4096  ;;  %p1885_p7 = scmp.lt.u32.totalorder %s2143_s26, %s2483_s1 }
  0x34   : > { %p1882_p3 = pnand %p1881_p0, %p1880_p13  ;;  %p1886_p9 = scmp.lt.u32.totalorder %s1884_s27, %s1879_s25 }
  0x35   : > { %p1888_p1 = scmp.lt.u32.totalorder %s1879_s25, %s2143_s26 }
  0x36   : > { %p1883_p5 = pneg %p1882_p3  ;;  %p1887_p2 = por %p1886_p9, %p1885_p7 }
  0x38   : > { %p1889_p4 = por %p1888_p1, %p1887_p2 }
  0x3a   : > { %p1890_p6 = pnand %p1889_p4, %p1883_p5 }
  0x3c   : > { %1893 = shalt.err (!%p1890_p6)
}
  0x3d   : > { %s1894_s14 = scalar_lea.vmem %s2149_s22, 2048  ;;  %s1984_s19 = smov [#allocation2]  }
  0x3e   : > { %p1895_p8 = scmp.ne.s32.totalorder %s2149_s22, %s1894_s14  ;;  %s1899_s16 = sshll.u32 %s1984_s19, 4  ;;  %s1900_s16 = int_to_ptr.vmem [resolvable:$false] %s1899_s16 }
  0x3f   : > { %s1901_s21 = scalar_lea.vmem %s1900_s16, 4096  ;;  %p1902_p3 = scmp.lt.s32.totalorder %s2149_s22, %s1900_s16 }
  0x40   : > { %p1897_p10 = pnand %p1895_p8, %p1881_p0  ;;  %p1903_p7 = scmp.lt.s32.totalorder %s1901_s21, %s1894_s14 }
  0x42   : > { %p1898_p13 = pneg %p1897_p10  ;;  %p1904_p9 = por %p1903_p7, %p1902_p3 }
  0x44   : > { %p1905_p2 = pnand %p1904_p9, %p1898_p13 }
  0x46   : > { %1908 = shalt.err (!%p1905_p2)
}
  0x47   : > { %s1985_s25 = smov 128   ;;  %s1986_s27 = smov 8  }
  0x48   : > { %1752 = dma.hbm_to_vmem [thread:$0]  (!%p2145_p11), %s2143_s26, 2048, %s2149_s22, %s2151_s24, %s1985_s25, %s1985_s25, %s1986_s27  }
  0x49   : > { %p2507_p0 = scmp.ne.s32.totalorder %s2501_s17, 0 }
  0x4a   : > { %s2182_s18 = sand.u32 (!%p2507_p0), 1, %s1971_s10   ;;  %p2508_p5 = scmp.ne.s32.totalorder (!%p2507_p0), %s2498_s15, 0 }
  0x4b   : > { %357 = sbr.rel (%p2507_p0) target bundleno = 1240 (0x4d8), region = 56  ;;  %s1446_s20 = sshll.u32 (!%p2507_p0), %s2182_s18, 7 }
  0x4c   : > { %s360_s14 = scalar_lea.sflag (!%p2507_p0), [#allocation3], %s2182_s18  ;;  %s2186_s19 = scalar_lea.vmem (!%p2507_p0), [#allocation2], %s1446_s20 }
  0x52   : > { %1954 = dma.done.wait (%p2508_p5), %s360_s14, 2048  }
  0x53   : > { %1956 = vsyncadd (%p2508_p5), %s360_s14, 4294965248  ;;  %p2509_p11 = scmp.eq.s32.totalorder %s2064_s13, 0 }
  0x55   : > { %1958 = dma.done.wait (%p2509_p11), [#allocation6], 4096   ;;  %p2510_p1 = pmov %p2509_p11 }
  0x56   : > { %p418_p4 = scmp.lt.s32.totalorder %s2064_s13, 1  ;;  %v1987_v0 = vmov 0.0   ;;  %vm1988_vm0 = vmmov 0   ;;  %v1989_v1 = vmov 0   ;;  %v2206_v2 = vld [vmem:[%s2186_s19] sm:$0xff]  ;;  %v2209_v3 = vld [vmem:[%s2186_s19 + $0x8] sm:$0xff] }
  0x57   : > { %1960 = vsyncadd (%p2510_p1), [#allocation6], 4294963200  ;;  %1579 = vmatprep.subr.bf16.mxu0 %v1987_v0  ;;  %1595 = vmatprep.mubr.msk.bf16.mxu0 %vm1988_vm0, %v1987_v0  ;;  %v2214_v4 = vld [vmem:[%s2488_s6] ss:$0 sm:$0xff]  ;;  %v754_v7 = vpack.c.bf16 %v2209_v3, %v2206_v2  ;;  %v2223_v8 = vld [vmem:[%s2186_s19 + $0x10] sm:$0xff]  ;;  %vm604_vm1 = vcmask 130048  }
  0x58   : > { %s2201_s15 = scalar_select %p418_p4, %s2064_s13, 1  ;;  %1803 = vset.pattern.permute.xlu1 %v1989_v1  ;;  %v474_v5 = vmul.f32 %v2214_v4, %v2206_v2  ;;  %v475_v6 = vmul.f32 %v2214_v4, %v2209_v3  ;;  %v2226_v9 = vld [vmem:[%s2186_s19 + $0x18] sm:$0xff]  ;;  %v476_v11 = vmul.f32 %v2214_v4, %v2223_v8  ;;  %v1453_v15 = vld [vmem:[%s2487_s5] ss:$0 sm:$0xff]  ;;  %v2255_v21 = vld [vmem:[%s2186_s19 + $0x28] sm:$0xff] }
  0x59   : > { %v477_v12 = vmul.f32 %v2214_v4, %v2226_v9  ;;  %v2252_v20 = vld [vmem:[%s2186_s19 + $0x20] sm:$0xff]  ;;  %v479_v25 = vmul.f32 %v2214_v4, %v2255_v21  ;;  %v2267_v26 = vld [vmem:[%s2186_s19 + $0x30] sm:$0xff]  ;;  %v2270_v27 = vld [vmem:[%s2186_s19 + $0x38] sm:$0xff]  ;;  %s1506_s20 = sshll.u32 %s2064_s13, 8  ;;  %s1990_s13 = smov [#allocation7]  }
  0x5a   : > { %s1504_s17 = sshll.u32 %s2201_s15, 4  ;;  %v490_v10 = vpack.c.bf16 %v475_v6, %v474_v5  ;;  %v478_v24 = vmul.f32 %v2214_v4, %v2252_v20  ;;  %v480_v29 = vmul.f32 %v2214_v4, %v2267_v26  ;;  %v481_v30 = vmul.f32 %v2214_v4, %v2270_v27  ;;  %v2278_v31 = vld [vmem:[%s2186_s19 + $0x40] sm:$0xff]  ;;  %v2281_v32 = vld [vmem:[%s2186_s19 + $0x48] sm:$0xff]  ;;  %v2289_v37 = vld [vmem:[%s2186_s19 + $0x50] sm:$0xff]  ;;  %s425_s26 = scalar_lea.vmem %s2484_s2, %s2201_s15 }
  0x5b   : > { %s422_s16 = scalar_lea.vmem %s2482_s0, %s1504_s17  ;;  %s430_s27 = scalar_lea.vmem %s2485_s3, %s1504_s17  ;;  %v491_v22 = vpack.c.bf16 %v477_v12, %v476_v11  ;;  %v482_v34 = vmul.f32 %v2214_v4, %v2278_v31  ;;  %v483_v35 = vmul.f32 %v2214_v4, %v2281_v32  ;;  %v2292_v38 = vld [vmem:[%s2186_s19 + $0x58] sm:$0xff]  ;;  %v484_v39 = vmul.f32 %v2214_v4, %v2289_v37  ;;  %v2300_v42 = vld [vmem:[%s2186_s19 + $0x60] sm:$0xff]  ;;  %v2303_v43 = vld [vmem:[%s2186_s19 + $0x68] sm:$0xff] }
  0x5c   : > { %1580 = vmatpush3.bf16.xpose.msra.mxu0 %v490_v10  ;;  %v2238_v13 = vld [vmem:[%s422_s16] sm:$0xff]  ;;  %v2241_v14 = vld [vmem:[%s422_s16 + $0x8] sm:$0xff]  ;;  %v492_v28 = vpack.c.bf16 %v479_v25, %v478_v24  ;;  %v493_v33 = vpack.c.bf16 %v481_v30, %v480_v29  ;;  %v485_v40 = vmul.f32 %v2214_v4, %v2292_v38  ;;  %v486_v44 = vmul.f32 %v2214_v4, %v2300_v42  ;;  %v2311_v47 = vld [vmem:[%s2186_s19 + $0x70] sm:$0xff]  ;;  %s433_s24 = scalar_lea.vmem %s2486_s4, %s2201_s15  ;;  %s1448_s15 = sshll.u32 %s2182_s18, 4 }
  0x5d   : > { %1581 = vmatprep.subr.bf16.mxu0 %v1987_v0  ;;  %v550_v16 = vld [vmem:[%s430_s27] sm:$0xff]  ;;  %v2248_v17 = vpack.c.bf16 %v2241_v14, %v2238_v13  ;;  %v461_v18 = vmul.f32 %v1453_v15, %v2238_v13  ;;  %v551_v19 = vld [vmem:[%s430_s27 + $0x8] sm:$0xff]  ;;  %v462_v23 = vmul.f32 %v1453_v15, %v2241_v14  ;;  %v494_v36 = vpack.c.bf16 %v483_v35, %v482_v34  ;;  %v2314_v48 = vld [vmem:[%s2186_s19 + $0x78] sm:$0xff]  ;;  %s417_s25 = scalar_lea.vmem [#allocation7], %s1448_s15  ;;  %s2438_s17 = scalar_lea.hbm %s2491_s9, %s1506_s20 }
  0x5e   : > { %554 = vperm.xlu1 %1803, %v550_v16   ;;  %v495_v41 = vpack.c.bf16 %v485_v40, %v484_v39  ;;  %v487_v45 = vmul.f32 %v2214_v4, %v2303_v43  ;;  %v488_v49 = vmul.f32 %v2214_v4, %v2311_v47  ;;  %v489_v50 = vmul.f32 %v2214_v4, %v2314_v48  ;;  %v1455_v53 = vld [vmem:[%s425_s26] ss:$0 sm:$0xff]  ;;  %s1313_s27 = sshll.u32 %s417_s25, 4  ;;  %s1300_s26 = scalar_lea.sflag [#allocation4], %s2182_s18  ;;  %s2433_s27 = int_to_ptr.vmem [resolvable:$true] %s1313_s27 }
  0x5f   : > { %463 = vadd.xlane.f32.xlu0 %v461_v18  ;;  %1599 = vmatprep.subr.bf16.mxu1 %v2248_v17  ;;  %v1464_v59 = vld [vmem:[%s433_s24] ss:$0 sm:$0xff]  ;;  %v757_v2 = vpack.c.bf16 %v2270_v27, %v2267_v26  ;;  %v761_v27 = vpack.c.bf16 %v2314_v48, %v2311_v47  ;;  %v1815_v48 = vld [vmem:[#allocation5 + $0x68] sm:$0xff]   ;;  %s1909_s22 = scalar_lea.vmem %s2433_s27, 256  ;;  %s1913_s23 = sshll.u32 %s1990_s13, 4  ;;  %s1914_s23 = int_to_ptr.vmem [resolvable:$false] %s1913_s23 }
  0x60   : > { %1600 = vmatpush3.bf16.msra.mxu1 %v2248_v17  ;;  %v496_v46 = vpack.c.bf16 %v487_v45, %v486_v44  ;;  %v497_v51 = vpack.c.bf16 %v489_v50, %v488_v49  ;;  %v1813_v47 = vld [vmem:[#allocation5 + $0x60] sm:$0xff]   ;;  %p1910_p6 = scmp.ne.s32.totalorder %s2433_s27, %s1909_s22  ;;  %s1915_s24 = scalar_lea.vmem %s1914_s23, 512 }
  0x61   : > { %1617 = vmatprep.subr.bf16.mxu1 %v1987_v0  ;;  %p1916_p13 = scmp.lt.s32.totalorder %s2433_s27, %s1914_s23  ;;  %p1917_p3 = scmp.lt.s32.totalorder %s1915_s24, %s1909_s22 }
  0x62   : > { %559 = vperm.xlu1 %1803, %v551_v19   ;;  %p1911_p8 = pnand %p1910_p6, %p2134_p12 }
  0x63   : > { %465 = vadd.xlane.f32.xlu0 %v462_v23  ;;  %p1918_p7 = por %p1917_p3, %p1916_p13 }
  0x64   : > { %1582 = vmatpush3.bf16.xpose.msra.mxu0 %v491_v22  ;;  %p1912_p10 = pneg %p1911_p8 }
  0x65   : > { %1583 = vmatprep.subr.bf16.mxu0 %v1987_v0 }
  0x66   : > { %p1919_p9 = pnand %p1918_p7, %p1912_p10 }
  0x6c   : > { %1584 = vmatpush3.bf16.xpose.msra.mxu0 %v492_v28 }
  0x6d   : > { %1585 = vmatprep.subr.bf16.mxu0 %v1987_v0 }
  0x74   : > { %1586 = vmatpush3.bf16.xpose.msra.mxu0 %v493_v33 }
  0x75   : > { %1587 = vmatprep.subr.bf16.mxu0 %v1987_v0 }
  0x7c   : > { %1588 = vmatpush3.bf16.xpose.msra.mxu0 %v494_v36 }
  0x7d   : > { %1589 = vmatprep.subr.bf16.mxu0 %v1987_v0 }
  0x84   : > { %1590 = vmatpush3.bf16.xpose.msra.mxu0 %v495_v41 }
  0x85   : > { %1591 = vmatprep.subr.bf16.mxu0 %v1987_v0 }
  0x8c   : > { %1592 = vmatpush3.bf16.xpose.msra.mxu0 %v496_v46 }
  0x8d   : > { %1593 = vmatprep.subr.bf16.mxu0 %v1987_v0 }
  0x94   : > { %1594 = vmatpush3.bf16.xpose.msra.mxu0 %v497_v51 }
  0x95   : > { %1657 = vmatprep.subr.bf16.mxu0 %v1987_v0 }
  0x9b   : > { %1596 = vmatmul.mubr.bf16.vlgmr.msra.gmra.mrb[0].mxu0 %v2248_v17 }
  0x9c   : > { %1673 = vmatprep.mubr.msk.bf16.mxu0 %vm1988_vm0, %v1987_v0 }
  0xdd   : > { %v555_v55 = vpop.permute.xlu1 %554 }
  0xe1   : > { %v560_v6 = vpop.permute.xlu1 %559 }
  0xec   : > { %v464_v52 = vpop.xlane.xlu0 %463 }
  0xed   : > { %v505_v56 = vadd.f32 %v1455_v53, %v464_v52 }
  0xf0   : > { %v466_v54 = vpop.xlane.xlu0 %465 }
  0xf1   : > { %v506_v57 = vadd.f32 %v1455_v53, %v466_v54 }
 0x16e   : > { %v541_v58 = vpop.f32.mrb[0].mxu0 }
 0x16f   : > { %v548_v60 = vadd.f32 %v541_v58, %v505_v56  ;;  %v1597_v61 = vpop.f32.mrb[1].mxu0 }
 0x170   : > { %v544_v62 = vpop.f32.mrb[2].mxu0  ;;  %v755_v61 = vpack.c.bf16 %v2226_v9, %v2223_v8  ;;  %v759_v9 = vpack.c.bf16 %v2292_v38, %v2289_v37  ;;  %v1809_v37 = vld [vmem:[#allocation5 + $0x50] sm:$0xff]  }
 0x171   : > { %v549_v63 = vadd.f32 %v544_v62, %v506_v57  ;;  %v1598_v4 = vpop.f32.mrb[3].mxu0  ;;  %v733_v5 = vadd.f32 %v1464_v59, %v548_v60  ;;  %v562_v10 = vadd.f32 %v555_v55, %v548_v60 }
 0x173   : > { %v563_v11 = vadd.f32 %v560_v6, %v549_v63  ;;  %735 = vmax.xlane.f32.xlu1 %v733_v5  ;;  %v734_v15 = vadd.f32 %v1464_v59, %v549_v63  ;;  %v756_v63 = vpack.c.bf16 %v2255_v21, %v2252_v20  ;;  %v760_v21 = vpack.c.bf16 %v2303_v43, %v2300_v42  ;;  %v1811_v42 = vld [vmem:[#allocation5 + $0x58] sm:$0xff]  }
 0x175   : > { %v564_v12 = vmax.f32 %v562_v10, %v563_v11 }
 0x177   : > { %v565_v16 = vrot.slane %v564_v12, 4  ;;  %737 = vmax.xlane.f32.xlu1 %v734_v15 }
 0x179   : > { %v566_v18 = vmax.f32 %v564_v12, %v565_v16 }
 0x17b   : > { %v567_v19 = vrot.slane %v566_v18, 2 }
 0x17d   : > { %v568_v22 = vmax.f32 %v566_v18, %v567_v19 }
 0x17f   : > { %v569_v23 = vrot.slane %v568_v22, 1 }
 0x181   : > { %v570_v24 = vmax.f32 %v568_v22, %v569_v23 }
 0x183   : > { %v571_v25 = vsub.f32 %v562_v10, %v570_v24  ;;  %v572_v28 = vsub.f32 %v563_v11, %v570_v24 }
 0x185   : > { %v573_v29 = vmul.f32 1.442695, %v571_v25  ;;  %v575_v30 = vmul.f32 1.442695, %v572_v28 }
 0x187   : > { %1837 = vpow2.f32 %v573_v29 }
 0x188   : > { %1839 = vpow2.f32 %v575_v30 }
 0x191   : > { %v1838_v33 = vpop.eup %1837 }
 0x192   : > { %v1840_v34 = vpop.eup %1839 }
 0x193   : > { %v577_v35 = vadd.f32 %v1840_v34, %v1838_v33 }
 0x195   : > { %v578_v36 = vrot.slane %v577_v35, 4 }
 0x197   : > { %v579_v39 = vadd.f32 %v578_v36, %v577_v35 }
 0x199   : > { %v580_v40 = vrot.slane %v579_v39, 2 }
 0x19b   : > { %v581_v41 = vadd.f32 %v580_v40, %v579_v39 }
 0x19d   : > { %v582_v44 = vrot.slane %v581_v41, 1 }
 0x19f   : > { %v583_v45 = vadd.f32 %v582_v44, %v581_v41 }
 0x1a1   : > { %1841 = vrcp.f32 %v583_v45  ;;  %v1819_v45 = vld [vmem:[#allocation5 + $0x78] sm:$0xff]  }
 0x1ab   : > { %v1842_v46 = vpop.eup %1841 }
 0x1ac   : > { %v585_v49 = vmul.f32 %v1842_v46, %v1838_v33  ;;  %v586_v50 = vmul.f32 %v1842_v46, %v1840_v34 }
 0x1ae   : > { %v587_v51 = vpack.c.bf16 %v586_v50, %v585_v49 }
 0x1b0   : > { %588 = vxpose.xlu0.c.b16.start.end [1/1] (short) %v587_v51, 128 }
 0x1b9   : > { %1804 = vset.pattern.permute.xlu0 %v1989_v1 }
 0x200   : > { %v736_v52 = vpop.xlane.xlu1 %735 }
 0x201   : > { %v739_v53 = vsub.f32 %v733_v5, %v736_v52  ;;  %v1817_v5 = vld [vmem:[#allocation5 + $0x70] sm:$0xff]  }
 0x203   : > { %v741_v54 = vmul.f32 1.442695, %v739_v53 }
 0x204   : > { %v738_v55 = vpop.xlane.xlu1 %737 }
 0x205   : > { %1843 = vpow2.f32 %v741_v54  ;;  %v740_v56 = vsub.f32 %v734_v15, %v738_v55  ;;  %v1806_v54 = vld [vmem:[#allocation5] sm:$0xff]   ;;  %v1808_v55 = vld [vmem:[#allocation5 + $0x8] sm:$0xff]  }
 0x207   : > { %v743_v57 = vmul.f32 1.442695, %v740_v56  ;;  %v1810_v56 = vld [vmem:[#allocation5 + $0x10] sm:$0xff]  }
 0x209   : > { %1845 = vpow2.f32 %v743_v57  ;;  %v1812_v57 = vld [vmem:[#allocation5 + $0x18] sm:$0xff]  }
 0x20f   : > { %v2334_v58 = vpop.eup %1843 }
 0x210   : > { %745 = vadd.xlane.f32.xlu1 %v2334_v58 }
 0x213   : > { %v2337_v59 = vpop.eup %1845 }
 0x214   : > { %747 = vadd.xlane.f32.xlu1 %v2337_v59 }
 0x216   : > { %v596_v60 = vpop.trf.xlu0 }
 0x217   : > { %1601 = vmatprep.mubr.msk.bf16.mxu1 %vm604_vm1, %v596_v60  ;;  %v1818_v60 = vld [vmem:[#allocation5 + $0x30] sm:$0xff]  }
 0x21a   : > { %v597_v1 = vpop.trf.xlu0 }
 0x21b   : > { %1602 = vmatmul.mubr.msk.bf16.vlgmr.msra.gmra.mrb[0].mxu1 %vm604_vm1, %v597_v1  ;;  %v1820_v1 = vld [vmem:[#allocation5 + $0x38] sm:$0xff]  }
 0x21c   : > { %1618 = vmatpush3.bf16.msra.mxu1 %v754_v7  ;;  %v758_v7 = vpack.c.bf16 %v2281_v32, %v2278_v31  ;;  %v1805_v31 = vld [vmem:[#allocation5 + $0x40] sm:$0xff]   ;;  %v1807_v32 = vld [vmem:[#allocation5 + $0x48] sm:$0xff]  }
 0x21d   : > { %1619 = vmatprep.subr.bf16.mxu1 %v1987_v0  ;;  %1658 = vmatpush3.bf16.msra.mxu0 %v1805_v31 }
 0x21e   : > { %v598_v62 = vpop.trf.xlu0  ;;  %1659 = vmatprep.subr.bf16.mxu0 %v1987_v0 }
 0x21f   : > { %1605 = vmatprep.mubr.msk.bf16.mxu1 %vm604_vm1, %v598_v62  ;;  %v1830_v62 = vld [vmem:[#allocation5 + $0xc8] sm:$0xff]  }
 0x220   : > { %1620 = vmatpush3.bf16.msra.mxu1 %v755_v61  ;;  %v1829_v61 = vld [vmem:[#allocation5 + $0xc0] sm:$0xff]  }
 0x221   : > { %1621 = vmatprep.subr.bf16.mxu1 %v1987_v0  ;;  %1660 = vmatpush3.bf16.msra.mxu0 %v1807_v32 }
 0x222   : > { %v599_v4 = vpop.trf.xlu0  ;;  %1661 = vmatprep.subr.bf16.mxu0 %v1987_v0 }
 0x223   : > { %1606 = vmatmul.mubr.msk.bf16.gmra.mrb[4].mxu1 %vm604_vm1, %v599_v4  ;;  %v1832_v4 = vld [vmem:[#allocation5 + $0xd8] sm:$0xff]  }
 0x224   : > { %1622 = vmatpush3.bf16.msra.mxu1 %v756_v63  ;;  %v1831_v63 = vld [vmem:[#allocation5 + $0xd0] sm:$0xff]  }
 0x225   : > { %1623 = vmatprep.subr.bf16.mxu1 %v1987_v0  ;;  %1662 = vmatpush3.bf16.msra.mxu0 %v1809_v37 }
 0x226   : > { %v600_v3 = vpop.trf.xlu0  ;;  %1663 = vmatprep.subr.bf16.mxu0 %v1987_v0 }
 0x227   : > { %1609 = vmatprep.mubr.msk.bf16.mxu1 %vm604_vm1, %v600_v3  ;;  %v1835_v3 = vld [vmem:[#allocation5 + $0xf0] sm:$0xff]  }
 0x228   : > { %1624 = vmatpush3.bf16.msra.mxu1 %v757_v2  ;;  %v1833_v2 = vld [vmem:[#allocation5 + $0xe0] sm:$0xff]  }
 0x229   : > { %1625 = vmatprep.subr.bf16.mxu1 %v1987_v0  ;;  %1664 = vmatpush3.bf16.msra.mxu0 %v1811_v42  ;;  %v1823_v42 = vld [vmem:[#allocation5 + $0x90] sm:$0xff]  }
 0x22a   : > { %v601_v8 = vpop.trf.xlu0  ;;  %1665 = vmatprep.subr.bf16.mxu0 %v1987_v0 }
 0x22b   : > { %1610 = vmatmul.mubr.msk.bf16.gmra.mrb[8].mxu1 %vm604_vm1, %v601_v8 }
 0x22c   : > { %1626 = vmatpush3.bf16.msra.mxu1 %v758_v7  ;;  %v1836_v7 = vld [vmem:[#allocation5 + $0xf8] sm:$0xff]  }
 0x22d   : > { %1627 = vmatprep.subr.bf16.mxu1 %v1987_v0  ;;  %1666 = vmatpush3.bf16.msra.mxu0 %v1813_v47  ;;  %v1825_v47 = vld [vmem:[#allocation5 + $0xa0] sm:$0xff]  }
 0x22e   : > { %v602_v20 = vpop.trf.xlu0  ;;  %1667 = vmatprep.subr.bf16.mxu0 %v1987_v0 }
 0x22f   : > { %1613 = vmatprep.mubr.msk.bf16.mxu1 %vm604_vm1, %v602_v20 }
 0x230   : > { %1628 = vmatpush3.bf16.msra.mxu1 %v759_v9 }
 0x231   : > { %1629 = vmatprep.subr.bf16.mxu1 %v1987_v0  ;;  %1668 = vmatpush3.bf16.msra.mxu0 %v1815_v48  ;;  %v1826_v48 = vld [vmem:[#allocation5 + $0xa8] sm:$0xff]  }
 0x232   : > { %v603_v26 = vpop.trf.xlu0  ;;  %1669 = vmatprep.subr.bf16.mxu0 %v1987_v0 }
 0x233   : > { %1614 = vmatmul.mubr.msk.bf16.gmra.mrb[12].mxu1 %vm604_vm1, %v603_v26 }
 0x234   : > { %1630 = vmatpush3.bf16.msra.mxu1 %v760_v21  ;;  %1633 = vmatprep.mubr.msk.bf16.mxu1 %vm1988_vm0, %v1987_v0  ;;  %v1821_v21 = vld [vmem:[#allocation5 + $0x80] sm:$0xff]  }
 0x235   : > { %1631 = vmatprep.subr.bf16.mxu1 %v1987_v0  ;;  %1670 = vmatpush3.bf16.msra.mxu0 %v1817_v5  ;;  %v1827_v5 = vld [vmem:[#allocation5 + $0xb0] sm:$0xff]  }
 0x236   : > { %1671 = vmatprep.subr.bf16.mxu0 %v1987_v0 }
 0x238   : > { %1632 = vmatpush3.bf16.msra.mxu1 %v761_v27 }
 0x239   : > { %1637 = vmatprep.subr.bf16.mxu1 %v1987_v0  ;;  %1672 = vmatpush3.bf16.msra.mxu0 %v1819_v45 }
 0x23a   : > { %1697 = vmatprep.subr.bf16.mxu0 %v1987_v0 }
 0x29d   : > { %v746_v38 = vpop.xlane.xlu1 %745 }
 0x29e   : > { %1847 = vrcp.f32 %v746_v38  ;;  %v1822_v38 = vld [vmem:[#allocation5 + $0x88] sm:$0xff]  }
 0x2a1   : > { %v748_v43 = vpop.xlane.xlu1 %747 }
 0x2a2   : > { %1849 = vrcp.f32 %v748_v43  ;;  %v1824_v43 = vld [vmem:[#allocation5 + $0x98] sm:$0xff]  }
 0x2a8   : > { %v1848_v6 = vpop.eup %1847 }
 0x2a9   : > { %v751_v11 = vmul.f32 %v1848_v6, %v2334_v58  ;;  %v1814_v58 = vld [vmem:[#allocation5 + $0x20] sm:$0xff]   ;;  %v1828_v6 = vld [vmem:[#allocation5 + $0xb8] sm:$0xff]  }
 0x2ac   : > { %v1850_v10 = vpop.eup %1849 }
 0x2ad   : > { %v752_v12 = vmul.f32 %v1850_v10, %v2337_v59  ;;  %v1816_v59 = vld [vmem:[#allocation5 + $0x28] sm:$0xff]  }
 0x2af   : > { %v753_v15 = vpack.c.bf16 %v752_v12, %v751_v11 }
 0x2b1   : > { %1634 = vmatmul.mubr.bf16.vlgmr.msra.gmra.mrb[16].mxu1 %v753_v15 }
 0x2b2   : > { %1653 = vmatprep.mubr.msk.bf16.mxu1 %vm1988_vm0, %v1987_v0 }
 0x2ee   : > { %v1603_v16 = vpop.f32.mrb[0].mxu1 }
 0x2ef   : > { %v663_v18 = vpop.f32.mrb[1].mxu1 }
 0x2f0   : > { %v1604_v19 = vpop.f32.mrb[2].mxu1 }
 0x2f1   : > { %v804_v22 = vpack.c.bf16 %v1604_v19, %v1603_v16  ;;  %v666_v23 = vpop.f32.mrb[3].mxu1 }
 0x2f2   : > { %v803_v24 = vpack.c.bf16 %v666_v23, %v663_v18 }
 0x2f4   : > { %1638 = vmatpush3.bf16.msra.mxu1 %v803_v24 }
 0x2f5   : > { %1639 = vmatprep.subr.bf16.mxu1 %v1987_v0 }
 0x2f6   : > { %v1607_v25 = vpop.f32.mrb[4].mxu1 }
 0x2f7   : > { %v679_v28 = vpop.f32.mrb[5].mxu1 }
 0x2f8   : > { %v1608_v29 = vpop.f32.mrb[6].mxu1  ;;  %1640 = vmatpush3.bf16.msra.mxu1 %v804_v22 }
 0x2f9   : > { %v806_v30 = vpack.c.bf16 %v1608_v29, %v1607_v25  ;;  %v682_v33 = vpop.f32.mrb[7].mxu1  ;;  %1641 = vmatprep.subr.bf16.mxu1 %v1987_v0 }
 0x2fa   : > { %v805_v34 = vpack.c.bf16 %v682_v33, %v679_v28 }
 0x2fc   : > { %1642 = vmatpush3.bf16.msra.mxu1 %v805_v34 }
 0x2fd   : > { %1643 = vmatprep.subr.bf16.mxu1 %v1987_v0 }
 0x2fe   : > { %v1611_v35 = vpop.f32.mrb[8].mxu1 }
 0x2ff   : > { %v695_v36 = vpop.f32.mrb[9].mxu1 }
 0x300   : > { %v1612_v39 = vpop.f32.mrb[10].mxu1  ;;  %1644 = vmatpush3.bf16.msra.mxu1 %v806_v30 }
 0x301   : > { %v808_v40 = vpack.c.bf16 %v1612_v39, %v1611_v35  ;;  %v698_v41 = vpop.f32.mrb[11].mxu1  ;;  %1645 = vmatprep.subr.bf16.mxu1 %v1987_v0 }
 0x302   : > { %v807_v44 = vpack.c.bf16 %v698_v41, %v695_v36 }
 0x304   : > { %1646 = vmatpush3.bf16.msra.mxu1 %v807_v44  ;;  %v1497_v44 = vld [vmem:[%s2490_s8] ss:$0 sm:$0xff] }
 0x305   : > { %1647 = vmatprep.subr.bf16.mxu1 %v1987_v0 }
 0x306   : > { %v1615_v46 = vpop.f32.mrb[12].mxu1 }
 0x307   : > { %v711_v49 = vpop.f32.mrb[13].mxu1 }
 0x308   : > { %v1616_v50 = vpop.f32.mrb[14].mxu1  ;;  %1648 = vmatpush3.bf16.msra.mxu1 %v808_v40 }
 0x309   : > { %v810_v51 = vpack.c.bf16 %v1616_v50, %v1615_v46  ;;  %v714_v52 = vpop.f32.mrb[15].mxu1  ;;  %1649 = vmatprep.subr.bf16.mxu1 %v1987_v0 }
 0x30a   : > { %v809_v53 = vpack.c.bf16 %v714_v52, %v711_v49 }
 0x30c   : > { %1650 = vmatpush3.bf16.msra.mxu1 %v809_v53 }
 0x30d   : > { %1651 = vmatprep.subr.bf16.mxu1 %v1987_v0 }
 0x310   : > { %1652 = vmatpush3.bf16.msra.mxu1 %v810_v51 }
 0x311   : > { %1677 = vmatprep.subr.bf16.mxu1 %v1987_v0 }
 0x313   : > { %1654 = vmatmul.mubr.bf16.vlgmr.msra.gmra.mrb[20].mxu1 %v753_v15 }
 0x314   : > { %1678 = vmatpush3.bf16.msra.mxu1 %v1806_v54  ;;  %1693 = vmatprep.mubr.msk.bf16.mxu1 %vm1988_vm0, %v1987_v0 }
 0x315   : > { %1679 = vmatprep.subr.bf16.mxu1 %v1987_v0 }
 0x318   : > { %1680 = vmatpush3.bf16.msra.mxu1 %v1808_v55 }
 0x319   : > { %1681 = vmatprep.subr.bf16.mxu1 %v1987_v0 }
 0x31c   : > { %1682 = vmatpush3.bf16.msra.mxu1 %v1810_v56 }
 0x31d   : > { %1683 = vmatprep.subr.bf16.mxu1 %v1987_v0 }
 0x320   : > { %1684 = vmatpush3.bf16.msra.mxu1 %v1812_v57 }
 0x321   : > { %1685 = vmatprep.subr.bf16.mxu1 %v1987_v0 }
 0x324   : > { %1686 = vmatpush3.bf16.msra.mxu1 %v1814_v58 }
 0x325   : > { %1687 = vmatprep.subr.bf16.mxu1 %v1987_v0 }
 0x328   : > { %1688 = vmatpush3.bf16.msra.mxu1 %v1816_v59 }
 0x329   : > { %1689 = vmatprep.subr.bf16.mxu1 %v1987_v0 }
 0x32c   : > { %1690 = vmatpush3.bf16.msra.mxu1 %v1818_v60 }
 0x32d   : > { %1691 = vmatprep.subr.bf16.mxu1 %v1987_v0 }
 0x330   : > { %1692 = vmatpush3.bf16.msra.mxu1 %v1820_v1 }
 0x331   : > { %1717 = vmatprep.subr.bf16.mxu1 %v1987_v0 }
 0x333   : > { %1694 = vmatmul.mubr.bf16.vlgmr.msra.gmra.mrb[24].mxu1 %v2248_v17  ;;  %v1834_v17 = vld [vmem:[#allocation5 + $0xe8] sm:$0xff]  }
 0x334   : > { %1718 = vmatpush3.bf16.msra.mxu1 %v1829_v61  ;;  %1733 = vmatprep.mubr.msk.bf16.mxu1 %vm1988_vm0, %v1987_v0 }
 0x335   : > { %1719 = vmatprep.subr.bf16.mxu1 %v1987_v0 }
 0x338   : > { %1720 = vmatpush3.bf16.msra.mxu1 %v1830_v62 }
 0x339   : > { %1721 = vmatprep.subr.bf16.mxu1 %v1987_v0 }
 0x33c   : > { %1722 = vmatpush3.bf16.msra.mxu1 %v1831_v63 }
 0x33d   : > { %1723 = vmatprep.subr.bf16.mxu1 %v1987_v0 }
 0x340   : > { %1724 = vmatpush3.bf16.msra.mxu1 %v1832_v4 }
 0x341   : > { %1725 = vmatprep.subr.bf16.mxu1 %v1987_v0 }
 0x344   : > { %1726 = vmatpush3.bf16.msra.mxu1 %v1833_v2 }
 0x345   : > { %1727 = vmatprep.subr.bf16.mxu1 %v1987_v0 }
 0x348   : > { %1728 = vmatpush3.bf16.msra.mxu1 %v1834_v17 }
 0x349   : > { %1729 = vmatprep.subr.bf16.mxu1 %v1987_v0 }
 0x34c   : > { %1730 = vmatpush3.bf16.msra.mxu1 %v1835_v3 }
 0x34d   : > { %1731 = vmatprep.subr.bf16.mxu1 %v1987_v0 }
 0x350   : > { %1732 = vmatpush3.bf16.msra.mxu1 %v1836_v7 }
 0x384   : > { %v796_v8 = vpop.f32.mrb[16].mxu1 }
 0x385   : > { %v1635_v9 = vpop.f32.mrb[17].mxu1  ;;  %v1064_v26 = vmul.f32 %v796_v8, %v2238_v13 }
 0x386   : > { %v799_v20 = vpop.f32.mrb[18].mxu1 }
 0x387   : > { %v868_v27 = vpack.c.bf16 %v799_v20, %v796_v8  ;;  %v1065_v31 = vmul.f32 %v799_v20, %v2241_v14  ;;  %v1636_v32 = vpop.f32.mrb[19].mxu1 }
 0x389   : > { %v1066_v37 = vpack.c.bf16 %v1065_v31, %v1064_v26  ;;  %1674 = vmatmul.mubr.bf16.vlgmr.msra.gmra.mrb[4].mxu0 %v868_v27 }
 0x38a   : > { %1698 = vmatpush3.bf16.msra.mxu0 %v1821_v21  ;;  %1713 = vmatprep.mubr.msk.bf16.mxu0 %vm1988_vm0, %v1987_v0 }
 0x38b   : > { %1699 = vmatprep.subr.bf16.mxu0 %v1987_v0 }
 0x38e   : > { %1700 = vmatpush3.bf16.msra.mxu0 %v1822_v38 }
 0x38f   : > { %1701 = vmatprep.subr.bf16.mxu0 %v1987_v0 }
 0x392   : > { %1702 = vmatpush3.bf16.msra.mxu0 %v1823_v42 }
 0x393   : > { %1703 = vmatprep.subr.bf16.mxu0 %v1987_v0 }
 0x396   : > { %1704 = vmatpush3.bf16.msra.mxu0 %v1824_v43 }
 0x397   : > { %1705 = vmatprep.subr.bf16.mxu0 %v1987_v0 }
 0x39a   : > { %1706 = vmatpush3.bf16.msra.mxu0 %v1825_v47 }
 0x39b   : > { %1707 = vmatprep.subr.bf16.mxu0 %v1987_v0 }
 0x39e   : > { %1708 = vmatpush3.bf16.msra.mxu0 %v1826_v48 }
 0x39f   : > { %1709 = vmatprep.subr.bf16.mxu0 %v1987_v0 }
 0x3a2   : > { %1710 = vmatpush3.bf16.msra.mxu0 %v1827_v5 }
 0x3a3   : > { %1711 = vmatprep.subr.bf16.mxu0 %v1987_v0 }
 0x3a6   : > { %1712 = vmatpush3.bf16.msra.mxu0 %v1828_v6 }
 0x3a9   : > { %1714 = vmatmul.mubr.bf16.vlgmr.msra.gmra.mrb[8].mxu0 %v1066_v37 }
 0x3e6   : > { %v845_v10 = vpop.f32.mrb[20].mxu1 }
 0x3e7   : > { %v1655_v11 = vpop.f32.mrb[21].mxu1  ;;  %v1175_v15 = vmul.f32 %v845_v10, %v2238_v13 }
 0x3e8   : > { %v848_v12 = vpop.f32.mrb[22].mxu1 }
 0x3e9   : > { %v1176_v16 = vmul.f32 %v848_v12, %v2241_v14  ;;  %v1656_v18 = vpop.f32.mrb[23].mxu1 }
 0x3eb   : > { %v1177_v19 = vpack.c.bf16 %v1176_v16, %v1175_v15 }
 0x3ed   : > { %1734 = vmatmul.mubr.bf16.vlgmr.msra.gmra.mrb[28].mxu1 %v1177_v19 }
 0x406   : > { %v1057_v22 = vpop.f32.mrb[24].mxu1 }
 0x407   : > { %v1695_v23 = vpop.f32.mrb[25].mxu1 }
 0x408   : > { %v1060_v24 = vpop.f32.mrb[26].mxu1 }
 0x409   : > { %v1696_v25 = vpop.f32.mrb[27].mxu1 }
 0x45c   : > { %v968_v28 = vpop.f32.mrb[4].mxu0 }
 0x45d   : > { %v1058_v29 = vadd.f32 %v1057_v22, %v968_v28  ;;  %v1675_v0 = vpop.f32.mrb[5].mxu0 }
 0x45e   : > { %v971_v30 = vpop.f32.mrb[6].mxu0 }
 0x45f   : > { %v1061_v33 = vadd.f32 %v1060_v24, %v971_v30  ;;  %v1676_v34 = vpop.f32.mrb[7].mxu0 }
 0x47c   : > { %v1166_v35 = vpop.f32.mrb[8].mxu0 }
 0x47d   : > { %v1173_v36 = vadd.f32 %v1166_v35, %v1058_v29  ;;  %v1715_v13 = vpop.f32.mrb[9].mxu0 }
 0x47e   : > { %v1169_v39 = vpop.f32.mrb[10].mxu0 }
 0x47f   : > { %v1174_v14 = vadd.f32 %v1169_v39, %v1061_v33  ;;  %v1716_v40 = vpop.f32.mrb[11].mxu0 }
 0x4c0   : > { %v1277_v41 = vpop.f32.mrb[28].mxu1 }
 0x4c1   : > { %v1284_v45 = vadd.f32 %v1277_v41, %v1173_v36  ;;  %v1735_v46 = vpop.f32.mrb[29].mxu1 }
 0x4c2   : > { %v1280_v49 = vpop.f32.mrb[30].mxu1 }
 0x4c3   : > { %v1293_v50 = vadd.f32 %v1497_v44, %v1284_v45  ;;  %v1285_v51 = vadd.f32 %v1280_v49, %v1174_v14  ;;  %v1736_v52 = vpop.f32.mrb[31].mxu1 }
 0x4c5   : > { %v1295_v53 = vmax.f32 %v1293_v50, 0.0  ;;  %v1294_v54 = vadd.f32 %v1497_v44, %v1285_v51 }
 0x4c7   : > { %1297 = vst [vmem:[%s417_s25] sm:$0xff] %v1295_v53  ;;  %v1296_v55 = vmax.f32 %v1294_v54, 0.0 }
 0x4c9   : > { %1298 = vst [vmem:[%s417_s25 + $0x8] sm:$0xff] %v1296_v55 }
 0x4ca   : > { %1922 = shalt.err (!%p1919_p9)
}
 0x4cb   : > { %s1923_s15 = scalar_lea.hbm %s2438_s17, 256  ;;  %s1927_s25 = scalar_lea.hbm %s2491_s9, 512 }
 0x4cc   : > { %p1924_p2 = scmp.ne.s32.totalorder %s2438_s17, %s1923_s15  ;;  %p1928_p11 = scmp.lt.u32.totalorder %s2438_s17, %s2491_s9 }
 0x4cd   : > { %p1929_p1 = scmp.lt.u32.totalorder %s1927_s25, %s1923_s15  ;;  %p1931_p6 = scmp.lt.u32.totalorder %s1923_s15, %s2438_s17 }
 0x4ce   : > { %p1925_p0 = pnand %p1924_p2, %p2134_p12 }
 0x4cf   : > { %p1930_p4 = por %p1929_p1, %p1928_p11 }
 0x4d0   : > { %p1926_p5 = pneg %p1925_p0 }
 0x4d1   : > { %p1932_p8 = por %p1931_p6, %p1930_p4 }
 0x4d3   : > { %p1933_p10 = pnand %p1932_p8, %p1926_p5 }
 0x4d5   : > { %1936 = shalt.err (!%p1933_p10)
}
 0x4d6   : > { %s1991_s19 = smov 128   ;;  %s1992_s22 = smov 8  }
 0x4d7   : > { %1743 = dma.vmem_to_hbm [thread:$0]  (%p2134_p12), %s2433_s27, 256, %s2438_s17, %s1300_s26, %s1991_s19, %s1991_s19, %s1992_s22  }
 0x4d8 PF: > { %s2511_s13 = sld [smem:[#allocation11_spill]]  ;;  %s1328_s23 = sand.u32 1, %s1967_s30  }
 0x4d9   : > { %p2513_p3 = scmp.ge.s32.totalorder %s1979_s12, 2  ;;  %s1329_s24 = scalar_lea.sflag [#allocation4], %s1328_s23 }
 0x4de   : > { %p2512_p13 = scmp.ne.s32.totalorder %s2511_s13, 0 }
 0x4e0   : > { %p1754_p7 = pnand %p2513_p3, %p2512_p13 }
 0x4e2   : > { %1962 = dma.done.wait (!%p1754_p7), %s1329_s24, 256  }
 0x4e3   : > { %1964 = vsyncadd (!%p1754_p7), %s1329_s24, 4294967040  ;;  %s2514_s12 = sld [smem:[#allocation12_spill]]  ;;  %s2515_s30 = smov %s1971_s10 }
 0x4e4   : > { %s2516_s10 = smov %s1975_s11  ;;  %s2517_s11 = smov %s2130_s28 }
 0x4e9   : > { %p23_p9 = scmp.ge.s32.totalorder %s2514_s12, 4  }
 0x4eb   :  { %25 = sbr.rel (!%p23_p9) target bundleno = 6 (0x6), region = 120 }
 0x4f2   :  { %1334 = vsyncpa [#allocation3], 1 }
 0x4f3   :  { %1336 = vsyncpa [#allocation3 + $0x1], 1 }
 0x4f4   :  { %1337 = vsyncpa [#allocation6], 1 }
 0x4f5   :  { %1338 = vsyncpa [#allocation4], 1 }
 0x4f6   :  { %1340 = vsyncpa [#allocation4 + $0x1], 1 }

</bundles_post_ra>
